<compile_context>
chip_gen: v7x
topology: tpu7x:2x2x1
jax: 0.10.0
libtpu: 0.0.40
codegen_flags: <defaults>
</compile_context>

<pallas_src>
import math

import jax
import jax.numpy as jnp
from jax.experimental import pallas as pl
from jax.experimental.pallas import tpu as pltpu


HIDDEN1 = 128
HIDDEN2 = 32


def _round_up(n, m):
    return ((n + m - 1) // m) * m


# ---------------------------------------------------------------------------
# Kernel: one batch tile -> lane-dense [advantage | value | pad] slab.
# ---------------------------------------------------------------------------
def noisy_dueling_kernel(
    x_ref,                      # (TB, NI)   f32   (cast to bf16 in-kernel)
    w1_ref, b1_ref,             # (NI, 256)  bf16, (1, 256) f32   fused towers
    w2_ref, b2_ref,             # (256, 64)  bf16, (1, 64)  f32   block-diag
    w34_ref, b34_ref,           # (64, OW)   bf16, (1, OW)  f32   folded noisy1@noisy2
    out_ref,                    # (TB, OW)   bf16  OW = round_up(A+1, 128)
):
    # Cast x on the VPU (VALU slot has slack); avoids a separate XLA cast pass.
    x = x_ref[...].astype(jnp.bfloat16)

    # Fused feature layer 1 of both towers: [adv | value], ReLU.
    h = jnp.dot(x, w1_ref[...], preferred_element_type=jnp.float32) + b1_ref[...]
    h = jnp.maximum(h, 0.0)

    # Fused feature layer 2 (block-diagonal), ReLU.
    h = jnp.dot(h.astype(jnp.bfloat16), w2_ref[...],
                preferred_element_type=jnp.float32) + b2_ref[...]
    h = jnp.maximum(h, 0.0)

    # Folded NoisyLinear #1 @ NoisyLinear #2 (legal: no activation between
    # them in the PyTorch forward) -> lane-dense slab [a_0..a_{A-1} | v | 0s].
    y = jnp.dot(h.astype(jnp.bfloat16), w34_ref[...],
                preferred_element_type=jnp.float32) + b34_ref[...]
    out_ref[...] = y.astype(out_ref.dtype)


# ---------------------------------------------------------------------------
# Wrapper: batch grid + resident weights + XLA epilogue for the global mean.
# ---------------------------------------------------------------------------
def noisy_dueling_dqn_forward(x, fused, num_actions, *, tile_b=2048):
    """x: (B, num_inputs) f32.  fused: dict from fuse_params().  -> (B, A) f32."""
    B, ni = x.shape
    out_width = fused["w34"].shape[1]

    # Batch tile: large (per-grid-step overhead ~0.35us), sublane-aligned (x8),
    # and chosen so the grid has >= 2 steps whenever B > 8 so v7x can shard
    # tiles across both TensorCores (weights are tiny and duplicated freely).
    TB = max(8, min(tile_b, _round_up(pl.cdiv(B, 2), 8)))
    Bp = _round_up(B, TB)

    xp = x
    if Bp != B:
        xp = jnp.pad(xp, ((0, Bp - B), (0, 0)))

    ws = (fused["w1"], fused["b1"], fused["w2"], fused["b2"],
          fused["w34"], fused["b34"])
    # Constant index_map -> parameters are fetched once and stay VMEM-resident
    # across all batch tiles; steady-state HBM traffic is only x in / slab out.
    w_specs = [pl.BlockSpec(a.shape, lambda i: (0, 0)) for a in ws]

    weight_bytes = sum(int(a.size) * a.dtype.itemsize for a in ws)
    cost = pl.CostEstimate(
        flops=2 * Bp * (ni * 2 * HIDDEN1 + 2 * HIDDEN1 * 2 * HIDDEN2
                        + 2 * HIDDEN2 * out_width),
        transcendentals=0,
        bytes_accessed=Bp * ni * 4 + Bp * out_width * 2 + weight_bytes,
    )

    slab = pl.pallas_call(
        noisy_dueling_kernel,
        out_shape=jax.ShapeDtypeStruct((Bp, out_width), jnp.bfloat16),
        grid=(Bp // TB,),
        in_specs=[pl.BlockSpec((TB, ni), lambda i: (i, 0))] + w_specs,
        out_specs=pl.BlockSpec((TB, out_width), lambda i: (i, 0)),
        compiler_params=pltpu.CompilerParams(
            dimension_semantics=("parallel",),        # v7x: shard over 2 TCs
            vmem_limit_bytes=32 * 1024 * 1024,        # explicit, safe on all gens
        ),
        cost_estimate=cost,
    )(xp, *ws)

    slab = slab[:B].astype(jnp.float32)
    a = slab[:, :num_actions]
    v = slab[:, num_actions:num_actions + 1]
    # Global scalar mean over (batch AND actions), exactly like PyTorch
    # `advantage.mean()`; kept as a tiny XLA epilogue so the kernel's batch
    # axis stays independent and parallelizable.
    return v + a - jnp.mean(a)


# ---------------------------------------------------------------------------
# Parameter construction (synthetic, deterministic) + fusion.
# ---------------------------------------------------------------------------
def _plain_linear(key, in_f, out_f):
    k1, k2 = jax.random.split(key)
    bound = 1.0 / math.sqrt(in_f)
    w = jax.random.uniform(k1, (in_f, out_f), jnp.float32, -bound, bound)
    b = jax.random.uniform(k2, (1, out_f), jnp.float32, -bound, bound)
    return w, b


def _scale_noise(key, size):
    x = jax.random.normal(key, (size,), jnp.float32)
    return jnp.sign(x) * jnp.sqrt(jnp.abs(x))


def _noisy_linear(key, in_f, out_f, std=0.4, training=True):
    """Effective weight/bias of NoisyLinear (mu + sigma*eps if training)."""
    k1, k2, k3, k4 = jax.random.split(key, 4)
    mu_range = 1.0 / math.sqrt(in_f)
    w_mu = jax.random.uniform(k1, (in_f, out_f), jnp.float32, -mu_range, mu_range)
    b_mu = jax.random.uniform(k2, (1, out_f), jnp.float32, -mu_range, mu_range)
    if not training:
        return w_mu, b_mu
    w_sigma = jnp.full((in_f, out_f), std / math.sqrt(in_f), jnp.float32)
    b_sigma = jnp.full((1, out_f), std / math.sqrt(out_f), jnp.float32)
    eps_in = _scale_noise(k3, in_f)
    eps_out = _scale_noise(k4, out_f)
    w_eps = eps_in[:, None] * eps_out[None, :]        # factored Gaussian noise
    b_eps = eps_out[None, :]
    return w_mu + w_sigma * w_eps, b_mu + b_sigma * b_eps


def init_params(key, num_inputs, num_actions, std=0.4, training=True):
    """Per-layer effective weights [in,out] / biases [1,out] for both towers."""
    keys = jax.random.split(key, 8)
    p = {}
    p["wa1"], p["ba1"] = _plain_linear(keys[0], num_inputs, HIDDEN1)
    p["wa2"], p["ba2"] = _plain_linear(keys[1], HIDDEN1, HIDDEN2)
    p["wa3"], p["ba3"] = _noisy_linear(keys[2], HIDDEN2, HIDDEN2, std, training)
    p["wa4"], p["ba4"] = _noisy_linear(keys[3], HIDDEN2, num_actions, std, training)
    p["wv1"], p["bv1"] = _plain_linear(keys[4], num_inputs, HIDDEN1)
    p["wv2"], p["bv2"] = _plain_linear(keys[5], HIDDEN1, HIDDEN2)
    p["wv3"], p["bv3"] = _noisy_linear(keys[6], HIDDEN2, HIDDEN2, std, training)
    p["wv4"], p["bv4"] = _noisy_linear(keys[7], HIDDEN2, 1, std, training)
    return p


def fuse_params(p, num_actions):
    """Fuse both towers into 3 wide (block-diagonal) matmuls; weights -> bf16.

    The two NoisyLinear layers have no activation between them, so they are
    folded into a single matmul in f32:  w34 = w3 @ w4,  b34 = b3 @ w4 + b4.
    """
    A = num_actions
    out_width = _round_up(A + 1, 128)                 # lane-dense output slab

    w1 = jnp.concatenate([p["wa1"], p["wv1"]], axis=1)            # (ni, 256)
    b1 = jnp.concatenate([p["ba1"], p["bv1"]], axis=1)            # (1, 256)

    w2 = jnp.zeros((2 * HIDDEN1, 2 * HIDDEN2), jnp.float32)
    w2 = w2.at[:HIDDEN1, :HIDDEN2].set(p["wa2"])
    w2 = w2.at[HIDDEN1:, HIDDEN2:].set(p["wv2"])                  # (256, 64)
    b2 = jnp.concatenate([p["ba2"], p["bv2"]], axis=1)

    # Block-diagonal noisy layers, folded per tower in f32.
    wa34 = p["wa3"] @ p["wa4"]                                    # (32, A)
    ba34 = p["ba3"] @ p["wa4"] + p["ba4"]                         # (1, A)
    wv34 = p["wv3"] @ p["wv4"]                                    # (32, 1)
    bv34 = p["bv3"] @ p["wv4"] + p["bv4"]                         # (1, 1)

    w34 = jnp.zeros((2 * HIDDEN2, out_width), jnp.float32)
    w34 = w34.at[:HIDDEN2, :A].set(wa34)                          # advantage cols
    w34 = w34.at[HIDDEN2:, A:A + 1].set(wv34)                     # value col
    b34 = jnp.zeros((1, out_width), jnp.float32)
    b34 = b34.at[:, :A].set(ba34).at[:, A:A + 1].set(bv34)

    bf = jnp.bfloat16
    return dict(w1=w1.astype(bf), b1=b1, w2=w2.astype(bf), b2=b2,
                w34=w34.astype(bf), b34=b34)


# ---------------------------------------------------------------------------
# Pure-JAX reference (unfused towers, layer-by-layer, bf16 weights / f32 acc).
# ---------------------------------------------------------------------------
def _reference(x, p, num_actions):
    def lin(h, w, b, relu=False):
        y = jnp.dot(h.astype(jnp.bfloat16), w.astype(jnp.bfloat16),
                    preferred_element_type=jnp.float32) + b
        return jnp.maximum(y, 0.0) if relu else y

    a = lin(x, p["wa1"], p["ba1"], relu=True)
    a = lin(a, p["wa2"], p["ba2"], relu=True)
    a = lin(a, p["wa3"], p["ba3"])            # NoisyLinear, no activation
    a = lin(a, p["wa4"], p["ba4"])            # NoisyLinear -> (B, A)
    v = lin(x, p["wv1"], p["bv1"], relu=True)
    v = lin(v, p["wv2"], p["bv2"], relu=True)
    v = lin(v, p["wv3"], p["bv3"])
    v = lin(v, p["wv4"], p["bv4"])            # (B, 1)
    return v + a - jnp.mean(a)


if __name__ == "__main__":
    NUM_INPUTS, NUM_ACTIONS = 32, 8

    key = jax.random.PRNGKey(0)
    kx, kx2, kp = jax.random.split(key, 3)

    # Effective (noise-applied, training=True) parameters; fused for the kernel.
    params = init_params(kp, NUM_INPUTS, NUM_ACTIONS, training=True)
    fused = fuse_params(params, NUM_ACTIONS)

    # --- small case: B=2 (single tile) -------------------------------------
    B = 2
    x = jax.random.normal(kx, (B, NUM_INPUTS), jnp.float32)
    out = noisy_dueling_dqn_forward(x, fused, NUM_ACTIONS)
    out = jax.block_until_ready(out)
    ref = _reference(x, params, NUM_ACTIONS)
    assert out.shape == (B, NUM_ACTIONS)
    assert jnp.allclose(out, ref, atol=2e-2, rtol=2e-2), (out, ref)

    # --- multi-tile / padded-batch case: B=1500, tile_b=512 (grid=3) --------
    B2 = 1500
    x2 = jax.random.normal(kx2, (B2, NUM_INPUTS), jnp.float32)
    out2 = noisy_dueling_dqn_forward(x2, fused, NUM_ACTIONS, tile_b=512)
    out2 = jax.block_until_ready(out2)
    ref2 = _reference(x2, params, NUM_ACTIONS)
    assert out2.shape == (B2, NUM_ACTIONS)
    assert jnp.allclose(out2, ref2, atol=2e-2, rtol=2e-2)

    print("KERNEL_OK")
</pallas_src>

<mosaic_0001>
module attributes {stable_mosaic.version = 11 : i64} {
  func.func @noisy_dueling_kernel(%arg0: i32, %arg1: memref<8x32xf32, #tpu.memory_space<vmem>>, %arg2: memref<32x256xbf16, #tpu.memory_space<vmem>>, %arg3: memref<1x256xf32, #tpu.memory_space<vmem>>, %arg4: memref<256x64xbf16, #tpu.memory_space<vmem>>, %arg5: memref<1x64xf32, #tpu.memory_space<vmem>>, %arg6: memref<64x128xbf16, #tpu.memory_space<vmem>>, %arg7: memref<1x128xf32, #tpu.memory_space<vmem>>, %arg8: memref<8x128xbf16, #tpu.memory_space<vmem>>) attributes {dimension_semantics = [#tpu.dimension_semantics<parallel>], iteration_bounds = array<i64: 1>, scalar_prefetch = 0 : i64, scratch_operands = 0 : i64, tpu.core_type = #tpu.core_type<tc>, window_params = [{transform_indices = @transform_0, window_bounds = array<i64: 8, 32>}, {pipeline_mode = #tpu.pipeline_mode<synchronous>, transform_indices = @transform_1, window_bounds = array<i64: 32, 256>}, {pipeline_mode = #tpu.pipeline_mode<synchronous>, transform_indices = @transform_2, window_bounds = array<i64: 1, 256>}, {pipeline_mode = #tpu.pipeline_mode<synchronous>, transform_indices = @transform_3, window_bounds = array<i64: 256, 64>}, {pipeline_mode = #tpu.pipeline_mode<synchronous>, transform_indices = @transform_4, window_bounds = array<i64: 1, 64>}, {pipeline_mode = #tpu.pipeline_mode<synchronous>, transform_indices = @transform_5, window_bounds = array<i64: 64, 128>}, {pipeline_mode = #tpu.pipeline_mode<synchronous>, transform_indices = @transform_6, window_bounds = array<i64: 1, 128>}, {transform_indices = @transform_7, window_bounds = array<i64: 8, 128>}]} {
    %c0 = arith.constant 0 : index
    %c0_0 = arith.constant 0 : index
    %0 = vector.load %arg1[%c0, %c0_0] : memref<8x32xf32, #tpu.memory_space<vmem>>, vector<8x32xf32>
    %1 = arith.truncf %0 : vector<8x32xf32> to vector<8x32xbf16>
    %c0_1 = arith.constant 0 : index
    %c0_2 = arith.constant 0 : index
    %2 = vector.load %arg2[%c0_1, %c0_2] : memref<32x256xbf16, #tpu.memory_space<vmem>>, vector<32x256xbf16>
    %cst = arith.constant dense<0.000000e+00> : vector<8x256xf32>
    %3 = tpu.matmul %1, %2, %cst {dimension_numbers = #tpu.dot_dimension_numbers<[1], [0], [0], [1], [0, 0, 1, 1], [], []>} : vector<8x32xbf16>, vector<32x256xbf16>, vector<8x256xf32> -> vector<8x256xf32>
    %c0_3 = arith.constant 0 : index
    %c0_4 = arith.constant 0 : index
    %4 = vector.load %arg3[%c0_3, %c0_4] : memref<1x256xf32, #tpu.memory_space<vmem>>, vector<1x256xf32>
    %5 = vector.broadcast %4 : vector<1x256xf32> to vector<8x256xf32>
    %6 = arith.addf %3, %5 : vector<8x256xf32>
    %cst_5 = arith.constant 0.000000e+00 : f32
    %7 = vector.broadcast %cst_5 : f32 to vector<8x256xf32>
    %8 = arith.maximumf %6, %7 : vector<8x256xf32>
    %9 = arith.truncf %8 : vector<8x256xf32> to vector<8x256xbf16>
    %c0_6 = arith.constant 0 : index
    %c0_7 = arith.constant 0 : index
    %10 = vector.load %arg4[%c0_6, %c0_7] : memref<256x64xbf16, #tpu.memory_space<vmem>>, vector<256x64xbf16>
    %cst_8 = arith.constant dense<0.000000e+00> : vector<8x64xf32>
    %11 = tpu.matmul %9, %10, %cst_8 {dimension_numbers = #tpu.dot_dimension_numbers<[1], [0], [0], [1], [0, 0, 1, 1], [], []>} : vector<8x256xbf16>, vector<256x64xbf16>, vector<8x64xf32> -> vector<8x64xf32>
    %c0_9 = arith.constant 0 : index
    %c0_10 = arith.constant 0 : index
    %12 = vector.load %arg5[%c0_9, %c0_10] : memref<1x64xf32, #tpu.memory_space<vmem>>, vector<1x64xf32>
    %13 = vector.broadcast %12 : vector<1x64xf32> to vector<8x64xf32>
    %14 = arith.addf %11, %13 : vector<8x64xf32>
    %cst_11 = arith.constant 0.000000e+00 : f32
    %15 = vector.broadcast %cst_11 : f32 to vector<8x64xf32>
    %16 = arith.maximumf %14, %15 : vector<8x64xf32>
    %17 = arith.truncf %16 : vector<8x64xf32> to vector<8x64xbf16>
    %c0_12 = arith.constant 0 : index
    %c0_13 = arith.constant 0 : index
    %18 = vector.load %arg6[%c0_12, %c0_13] : memref<64x128xbf16, #tpu.memory_space<vmem>>, vector<64x128xbf16>
    %cst_14 = arith.constant dense<0.000000e+00> : vector<8x128xf32>
    %19 = tpu.matmul %17, %18, %cst_14 {dimension_numbers = #tpu.dot_dimension_numbers<[1], [0], [0], [1], [0, 0, 1, 1], [], []>} : vector<8x64xbf16>, vector<64x128xbf16>, vector<8x128xf32> -> vector<8x128xf32>
    %c0_15 = arith.constant 0 : index
    %c0_16 = arith.constant 0 : index
    %20 = vector.load %arg7[%c0_15, %c0_16] : memref<1x128xf32, #tpu.memory_space<vmem>>, vector<1x128xf32>
    %21 = vector.broadcast %20 : vector<1x128xf32> to vector<8x128xf32>
    %22 = arith.addf %19, %21 : vector<8x128xf32>
    %23 = arith.truncf %22 : vector<8x128xf32> to vector<8x128xbf16>
    %c0_17 = arith.constant 0 : index
    %c0_18 = arith.constant 0 : index
    %24 = vector.load %arg8[%c0_17, %c0_18] : memref<8x128xbf16, #tpu.memory_space<vmem>>, vector<8x128xbf16>
    tpu.vector_store %arg8[%c0_17, %c0_18], %23 {strides = array<i32>} : memref<8x128xbf16, #tpu.memory_space<vmem>>, vector<8x128xbf16>,
    return
  }
  func.func @transform_0(%arg0: i32) -> (i32, i32) {
    %c0_i32 = arith.constant 0 : i32
    %c0_i32_0 = arith.constant 0 : i32
    return %arg0, %c0_i32 : i32, i32
  }
  func.func @transform_1(%arg0: i32) -> (i32, i32) {
    %c0_i32 = arith.constant 0 : i32
    %c0_i32_0 = arith.constant 0 : i32
    %c0_i32_1 = arith.constant 0 : i32
    return %c0_i32, %c0_i32_0 : i32, i32
  }
  func.func @transform_2(%arg0: i32) -> (i32, i32) {
    %c0_i32 = arith.constant 0 : i32
    %c0_i32_0 = arith.constant 0 : i32
    %c0_i32_1 = arith.constant 0 : i32
    return %c0_i32, %c0_i32_0 : i32, i32
  }
  func.func @transform_3(%arg0: i32) -> (i32, i32) {
    %c0_i32 = arith.constant 0 : i32
    %c0_i32_0 = arith.constant 0 : i32
    %c0_i32_1 = arith.constant 0 : i32
    return %c0_i32, %c0_i32_0 : i32, i32
  }
  func.func @transform_4(%arg0: i32) -> (i32, i32) {
    %c0_i32 = arith.constant 0 : i32
    %c0_i32_0 = arith.constant 0 : i32
    %c0_i32_1 = arith.constant 0 : i32
    return %c0_i32, %c0_i32_0 : i32, i32
  }
  func.func @transform_5(%arg0: i32) -> (i32, i32) {
    %c0_i32 = arith.constant 0 : i32
    %c0_i32_0 = arith.constant 0 : i32
    %c0_i32_1 = arith.constant 0 : i32
    return %c0_i32, %c0_i32_0 : i32, i32
  }
  func.func @transform_6(%arg0: i32) -> (i32, i32) {
    %c0_i32 = arith.constant 0 : i32
    %c0_i32_0 = arith.constant 0 : i32
    %c0_i32_1 = arith.constant 0 : i32
    return %c0_i32, %c0_i32_0 : i32, i32
  }
  func.func @transform_7(%arg0: i32) -> (i32, i32) {
    %c0_i32 = arith.constant 0 : i32
    %c0_i32_0 = arith.constant 0 : i32
    return %arg0, %c0_i32 : i32, i32
  }
}

</mosaic_0001>

<bundles_post_ra>
// kernel: tpu_custom_call.1
= control target key start
LH: loop header
LB: loop body
LE: loop exit
PB: predicated region body
PF: predicated region fallthrough
CT: control target
= control target key end

     0   :  { %v512_v2 = vmov 0   ;;  %vm66_vm0 = vcmask 261120   ;;  %s652_s0 = inlined_call_operand.vmem [shape: f32[8,32], index: 0, kind: input, shape index: {}]   ;;  %s653_s1 = inlined_call_operand.vmem [shape: bf16[32,256], index: 1, kind: input, shape index: {}]   ;;  %s654_s2 = inlined_call_operand.vmem [shape: f32[1,256], index: 2, kind: input, shape index: {}]   ;;  %s655_s3 = inlined_call_operand.vmem [shape: bf16[256,64], index: 3, kind: input, shape index: {}]   ;;  %s656_s4 = inlined_call_operand.vmem [shape: f32[1,64], index: 4, kind: input, shape index: {}]   ;;  %s657_s5 = inlined_call_operand.vmem [shape: bf16[64,128], index: 5, kind: input, shape index: {}]   ;;  %s658_s6 = inlined_call_operand.vmem [shape: f32[1,128], index: 6, kind: input, shape index: {}]   ;;  %s659_s7 = inlined_call_operand.hbm [shape: bf16[8,128], index: 7, kind: output, shape index: {}]  }
   0x1   :  { %v462_v0 = vld [vmem:[%s653_s1 + $0x4] ss:$8 sps:$4 sm:$0xff]   ;;  %v464_v1 = vld [vmem:[%s653_s1] ss:$8 sps:$4 sm:$0xff]   ;;  %102 = vmatprep.mubr.bf16.mxu0 %v512_v2  ;;  %v465_v3 = vld [vmem:[%s653_s1 + $0x14] ss:$8 sps:$4 sm:$0xff]  }
   0x2   :  { %70 = vmatprep.subr.bf16.mxu0 %v462_v0  ;;  %v467_v4 = vld [vmem:[%s653_s1 + $0x10] ss:$8 sps:$4 sm:$0xff]   ;;  %v28_v5 = vld [vmem:[%s652_s0] sm:$0xff]  ;;  %v470_v8 = vld [vmem:[%s655_s3 + $0x48] sm:$0xff]  }
   0x3   :  { %71 = vmatpush1.bf16.msra.mxu0 %v464_v1  ;;  %v468_v6 = vld [vmem:[%s655_s3 + $0x40] sm:$0xff]   ;;  %v29_v9 = vpack.c.bf16 %v28_v5, %v28_v5  ;;  %v471_v10 = vld [vmem:[%s655_s3 + $0x8] sm:$0xff]   ;;  %v472_v11 = vld [vmem:[%s655_s3 + $0x50] sm:$0xff]  }
   0x4   :  { %72 = vmatprep.subr.bf16.mxu0 %v465_v3  ;;  %v469_v7 = vld [vmem:[%s655_s3] sm:$0xff]   ;;  %419 = vmatprep.subr.bf16.mxu1 %v468_v6  ;;  %v473_v12 = vld [vmem:[%s655_s3 + $0x10] sm:$0xff]   ;;  %v474_v13 = vld [vmem:[%s655_s3 + $0x58] sm:$0xff]  }
   0x5   :  { %420 = vmatpush3.bf16.msra.mxu1 %v469_v7  ;;  %v475_v14 = vld [vmem:[%s655_s3 + $0x18] sm:$0xff]   ;;  %v476_v15 = vld [vmem:[%s655_s3 + $0x60] sm:$0xff]   ;;  %v478_v17 = vld [vmem:[%s655_s3 + $0x68] sm:$0xff]  }
   0x6   :  { %421 = vmatprep.subr.bf16.mxu1 %v470_v8  ;;  %v477_v16 = vld [vmem:[%s655_s3 + $0x20] sm:$0xff]  }
   0x7   :  { %73 = vmatpush1.bf16.msra.mxu0 %v467_v4 }
   0x9   :  { %422 = vmatpush3.bf16.msra.mxu1 %v471_v10 }
   0xa   :  { %395 = vmatmul.mubr.msk.bf16.vlgmr.msra.gmra.mrb[0].mxu0 %vm66_vm0, %v29_v9  ;;  %423 = vmatprep.subr.bf16.mxu1 %v472_v11 }
   0xd   :  { %424 = vmatpush3.bf16.msra.mxu1 %v473_v12 }
   0xe   :  { %425 = vmatprep.subr.bf16.mxu1 %v474_v13 }
  0x11   :  { %426 = vmatpush3.bf16.msra.mxu1 %v475_v14 }
  0x12   :  { %427 = vmatprep.subr.bf16.mxu1 %v476_v15 }
  0x13   :  { %12 = vsyncpa [#allocation3], 0  ;;  %v479_v18 = vld [vmem:[%s655_s3 + $0x28] sm:$0xff]   ;;  %v480_v19 = vld [vmem:[%s655_s3 + $0x70] sm:$0xff]   ;;  %v513_v24 = vmov 0.0   ;;  %v36_v26 = vlaneseq  ;;  %vm514_vm1 = vmmov 0  }
  0x14   :  { %v481_v20 = vld [vmem:[%s655_s3 + $0x30] sm:$0xff]   ;;  %v482_v21 = vld [vmem:[%s655_s3 + $0x78] sm:$0xff]   ;;  %v484_v23 = vld [vmem:[%s657_s5] sm:$0xff]   ;;  %446 = vmatprep.subr.bf16.mxu0 %v513_v24  ;;  %454 = vmatprep.mubr.msk.bf16.mxu0 %vm514_vm1, %v513_v24  ;;  %vm331_vm2 = vcmask 523264  }
  0x15   :  { %428 = vmatpush3.bf16.msra.mxu1 %v477_v16  ;;  %v483_v22 = vld [vmem:[%s655_s3 + $0x38] sm:$0xff]   ;;  %447 = vmatpush3.bf16.msra.mxu0 %v484_v23  ;;  %v485_v25 = vld [vmem:[%s657_s5 + $0x8] sm:$0xff]   ;;  %v37_v27 = vshrl.u32 %v36_v26, 7  ;;  %v34_v29 = vld [vmem:[%s654_s2] sm:$0x3] }
  0x16   :  { %429 = vmatprep.subr.bf16.mxu1 %v478_v17  ;;  %448 = vmatprep.subr.bf16.mxu0 %v513_v24  ;;  %v486_v43 = vld [vmem:[%s657_s5 + $0x10] sm:$0xff]   ;;  %v487_v44 = vld [vmem:[%s657_s5 + $0x18] sm:$0xff]   ;;  %v396_v46 = vld [vmem:[%s656_s4] ss:$0 sm:$0xff]  ;;  %s515_s5 = smov [#allocation2]  }
  0x17   :  { %v38_v28 = vsub.s32 0, %v37_v27  ;;  %v42_v30 = vsub.s32 1, %v37_v27  ;;  %v413_v54 = vld [vmem:[%s658_s6] ss:$0 sm:$0xff]  ;;  %s383_s28 = sshll.u32 %s515_s5, 4  ;;  %s384_s28 = int_to_ptr.vmem [resolvable:$true] %s383_s28 }
  0x18   :  { %s488_s4 = scalar_lea.vmem %s384_s28, 64  ;;  %p493_p1 = scmp.lt.s32.totalorder %s384_s28, %s384_s28 }
  0x19   :  { %430 = vmatpush3.bf16.msra.mxu1 %v479_v18  ;;  %449 = vmatpush3.bf16.msra.mxu0 %v485_v25  ;;  %v39_v31 = vrot.slane %v34_v29, %v38_v28  ;;  %v43_v32 = vrot.slane %v34_v29, %v42_v30  ;;  %p489_p0 = scmp.ne.s32.totalorder %s384_s28, %s488_s4  ;;  %p494_p2 = scmp.lt.s32.totalorder %s488_s4, %s488_s4 }
  0x1a   :  { %431 = vmatprep.subr.bf16.mxu1 %v480_v19  ;;  %450 = vmatprep.subr.bf16.mxu0 %v513_v24 }
  0x1b   :  { %p495_p3 = por %p494_p2, %p493_p1 }
  0x1d   :  { %432 = vmatpush3.bf16.msra.mxu1 %v481_v20  ;;  %451 = vmatpush3.bf16.msra.mxu0 %v486_v43  ;;  %p496_p4 = pnand %p495_p3, %p489_p0 }
  0x1e   :  { %433 = vmatprep.subr.bf16.mxu1 %v482_v21  ;;  %452 = vmatprep.subr.bf16.mxu0 %v513_v24 }
  0x21   :  { %434 = vmatpush3.bf16.msra.mxu1 %v483_v22  ;;  %453 = vmatpush3.bf16.msra.mxu0 %v487_v44 }
  0xdd   :  { %v104_v33 = vpop.f32.mrb[0].mxu0 }
  0xde   :  { %v105_v34 = vadd.f32 %v104_v33, %v39_v31  ;;  %v106_v35 = vpop.f32.mrb[1].mxu0 }
  0xdf   :  { %v107_v36 = vadd.f32 %v106_v35, %v43_v32  ;;  %v108_v37 = vpop.f32.mrb[2].mxu0 }
  0xe0   :  { %v111_v38 = vmax.f32 %v105_v34, 0.0  ;;  %v109_v39 = vpop.f32.mrb[3].mxu0 }
  0xe1   :  { %v112_v40 = vmax.f32 %v107_v36, 0.0 }
  0xe2   :  { %v113_v42 = vpack.c.bf16 %v111_v38, %v111_v38 }
  0xe3   :  { %v114_v41 = vpack.c.bf16 %v112_v40, %v112_v40 }
  0xe5   :  { %282 = vmatprep.mubr.bf16.mxu1 %v114_v41 }
  0xe6   :  { %283 = vmatmul.mubr.bf16.vlgmr.msra.gmra.mrb[0].mxu1 %v113_v42 }
 0x1b9   :  { %v435_v45 = vpop.f32.mrb[0].mxu1 }
 0x1ba   :  { %v436_v47 = vpop.f32.mrb[1].mxu1 }
 0x1bb   :  { %v437_v48 = vadd.f32 %v436_v47, %v435_v45  ;;  %v438_v49 = vpop.f32.mrb[2].mxu1 }
 0x1bc   :  { %v439_v50 = vpop.f32.mrb[3].mxu1 }
 0x1bd   :  { %v285_v51 = vadd.f32 %v437_v48, %v396_v46 }
 0x1bf   :  { %v290_v52 = vmax.f32 %v285_v51, 0.0 }
 0x1c1   :  { %v291_v53 = vpack.c.bf16 %v290_v52, %v290_v52 }
 0x1c3   :  { %455 = vmatmul.mubr.msk.bf16.vlgmr.msra.gmra.mrb[4].mxu0 %vm331_vm2, %v291_v53 }
 0x296   :  { %v369_v55 = vpop.f32.mrb[4].mxu0 }
 0x297   :  { %v370_v56 = vadd.f32 %v413_v54, %v369_v55  ;;  %v456_v57 = vpop.f32.mrb[5].mxu0 }
 0x298   :  { %v372_v58 = vpop.f32.mrb[6].mxu0 }
 0x299   :  { %v375_v59 = vpack.c.bf16 %v370_v56, %v370_v56  ;;  %v457_v60 = vpop.f32.mrb[7].mxu0 }
 0x29b   :  { %376 = vst [vmem:[#allocation2] sm:$0xf] %v375_v59 }
 0x29c   :  { %499 = shalt.err (!%p496_p4)
}
 0x29d   :  { %s500_s6 = scalar_lea.hbm %s659_s7, 64 }
 0x29e   :  { %p501_p5 = scmp.ne.s32.totalorder %s659_s7, %s500_s6  ;;  %p504_p6 = scmp.lt.u32.totalorder %s500_s6, %s659_s7 }
 0x2a0   :  { %p506_p7 = pnand %p504_p6, %p501_p5 }
 0x2a2   :  { %509 = shalt.err (!%p506_p7)
}
 0x2a3   :  { %386 = dma.vmem_to_hbm [thread:$0]  %s384_s28, 64, %s659_s7, [#allocation3]  }
 0x2a4   :  { %510 = dma.done.wait [#allocation3], 64  }
 0x2a5   :  { %511 = vsyncadd [#allocation3], 4294967232 }
 0x2a6   :  { %390 = vsyncpa [#allocation3], 1 }

</bundles_post_ra>
